<compile_context>
chip_gen: v7x
topology: tpu7x:2x2x1
jax: 0.10.0
libtpu: 0.0.40
codegen_flags: <defaults>
</compile_context>

<pallas_src>
import jax
import jax.numpy as jnp
from jax.experimental import pallas as pl
from jax.experimental.pallas import tpu as pltpu


# ---------------------------------------------------------------------------
# Kernel: one batch tile of the mean head.  MXU matmul (bf16 in, f32 accum),
# bias add on the VPU, unpadded lane-narrow store (16x less HBM writeback than
# a 128-lane-padded output for d_out=8).
# ---------------------------------------------------------------------------
def _diag_gaussian_mean_kernel(x_ref, wT_ref, b_ref, mean_ref):
    acc = jnp.dot(x_ref[...], wT_ref[...], preferred_element_type=jnp.float32)
    mean_ref[...] = (acc + b_ref[...]).astype(mean_ref.dtype)


def _round_up(x, m):
    return ((x + m - 1) // m) * m


def _num_tensorcores_per_chip():
    try:
        kind = jax.devices()[0].device_kind.lower()
    except Exception:
        return 1
    return 2 if ("v7" in kind or "7x" in kind) else 1


def _batch_tiling(B, num_cores):
    """Pick (tm, grid, padded_B): multiple-of-8 tiles covering round_up(B, 8)."""
    b8 = _round_up(B, 8)
    ntiles = pl.cdiv(b8, 1024)                # tm cap 1024 on all generations
    if num_cores >= 2 and b8 > 128:           # v7x: use both TensorCores
        ntiles = _round_up(max(ntiles, num_cores), num_cores)
    tm = _round_up(pl.cdiv(b8, ntiles), 8)
    grid = pl.cdiv(b8, tm)
    return tm, grid, grid * tm                # waste < 8 rows typical


def _vmem_limit_bytes(tm, d_in, d_out, in_itemsize):
    # double-buffered x / out tiles + (double-buffered) resident weights/bias
    need = (2 * tm * d_in * in_itemsize       # x tile
            + 2 * tm * d_out * 4              # out tile (f32)
            + 2 * d_in * d_out * in_itemsize  # wT (resident)
            + 2 * d_out * 4)                  # bias (resident)
    need = 2 * need + (1 << 20)               # generous compiler-scratch headroom
    if need <= 12 * 1024 * 1024:              # under every generation's default
        return None
    return int(min(need, 48 * 1024 * 1024))   # stay under v7x's 64 MiB physical


# ---------------------------------------------------------------------------
# One-time parameter preparation (transpose + cast done ONCE, not per forward
# call).  Mirrors DiagGaussian.__init__ parameter layout.
# ---------------------------------------------------------------------------
def prepare_params(w_mean, b_mean, logstd_bias, param_dtype=jnp.bfloat16):
    """w_mean: (d_out, d_in) PyTorch Linear layout; b_mean, logstd_bias: (d_out,)."""
    w = jnp.asarray(w_mean, jnp.float32)
    d_out, _ = w.shape
    return {
        "wT": w.T.astype(param_dtype),                        # (d_in, d_out)
        "b": jnp.asarray(b_mean, jnp.float32).reshape(1, d_out),
        "logstd": jnp.asarray(logstd_bias, jnp.float32),      # (d_out,)
    }


# ---------------------------------------------------------------------------
# Forward: returns (action_mean (B, d_out), action_std (d_out,)) of FixedNormal.
# ---------------------------------------------------------------------------
@jax.jit
def _forward_impl(x, wT, b, logstd):
    B, d_in = x.shape
    d_out = wT.shape[1]

    if B == 0:  # empty-batch guard (avoids a zero-sized grid)
        return jnp.zeros((0, d_out), jnp.float32), jnp.exp(logstd)

    tm, grid, b_pad = _batch_tiling(B, _num_tensorcores_per_chip())

    x = x.astype(wT.dtype)                    # bf16 feed; f32 accumulation below
    if b_pad != B:                            # <8 rows waste; absent when B % 8 == 0
        x = jnp.pad(x, ((0, b_pad - B), (0, 0)))

    compiler_params = pltpu.CompilerParams(
        dimension_semantics=("parallel",),
        vmem_limit_bytes=_vmem_limit_bytes(tm, d_in, d_out, wT.dtype.itemsize),
    )

    mean = pl.pallas_call(
        _diag_gaussian_mean_kernel,
        grid=(grid,),
        in_specs=[
            pl.BlockSpec((tm, d_in), lambda i: (i, 0)),     # x: batch-tiled
            pl.BlockSpec((d_in, d_out), lambda i: (0, 0)),  # wT: resident
            pl.BlockSpec((1, d_out), lambda i: (0, 0)),     # bias: resident
        ],
        out_specs=pl.BlockSpec((tm, d_out), lambda i: (i, 0)),
        out_shape=jax.ShapeDtypeStruct((b_pad, d_out), jnp.float32),
        compiler_params=compiler_params,
    )(x, wT, b)

    if b_pad != B:
        mean = mean[:B]

    # AddBias on zeros == broadcast of the logstd bias; std depends only on the
    # (d_out,) parameter, so return it un-broadcast (consumers of FixedNormal
    # broadcast it against the mean for free -- no (B, d_out) HBM write here).
    return mean, jnp.exp(logstd)


def diag_gaussian_forward(x, params):
    return _forward_impl(x, params["wT"], params["b"], params["logstd"])


# ---------------------------------------------------------------------------
# Deterministic orthogonal init (matches DiagGaussian defaults: gain=0.01,
# zero bias, zero logstd bias).
# ---------------------------------------------------------------------------
def orthogonal_init(key, shape, gain):
    rows, cols = shape
    a = jax.random.normal(key, (max(rows, cols), min(rows, cols)), jnp.float32)
    q, r = jnp.linalg.qr(a)
    q = q * jnp.sign(jnp.diag(r))
    q = q[:rows, :cols] if rows >= cols else q[:cols, :rows].T
    return gain * q


if __name__ == "__main__":
    # Small shapes consistent with DiagGaussian: Linear(num_inputs -> num_outputs)
    B, NUM_INPUTS, NUM_OUTPUTS = 8, 32, 8
    GAIN = 0.01

    key = jax.random.PRNGKey(0)
    kx, kw = jax.random.split(key)

    x = jax.random.normal(kx, (B, NUM_INPUTS), dtype=jnp.float32)

    w_mean = orthogonal_init(kw, (NUM_OUTPUTS, NUM_INPUTS), GAIN)
    b_mean = jnp.zeros((NUM_OUTPUTS,), jnp.float32)
    logstd_bias = jnp.zeros((NUM_OUTPUTS,), jnp.float32)

    params = prepare_params(w_mean, b_mean, logstd_bias)   # one-time prep

    mean, std = diag_gaussian_forward(x, params)
    jax.block_until_ready((mean, std))

    # Reference 1: exact-math reference at the kernel's precision
    # (bf16-rounded inputs, f32 accumulation) -- tight tolerance.
    x_bf = x.astype(jnp.bfloat16).astype(jnp.float32)
    w_bf = params["wT"].astype(jnp.float32)
    ref_mean_bf = x_bf @ w_bf + b_mean[None, :]
    # Reference 2: full-f32 module semantics -- checks the bf16 feed stays tiny.
    ref_mean_f32 = x @ w_mean.T + b_mean[None, :]
    ref_std = jnp.exp(logstd_bias)

    assert mean.shape == (B, NUM_OUTPUTS) and std.shape == (NUM_OUTPUTS,)
    assert jnp.allclose(mean, ref_mean_bf, atol=1e-5), "mean mismatch (kernel math)"
    assert jnp.allclose(mean, ref_mean_f32, atol=2e-3), "mean mismatch (f32 module ref)"
    assert jnp.allclose(std, ref_std, atol=1e-6), "std mismatch"
    # FixedNormal(mean, std) downstream broadcasts std against the mean:
    assert jnp.broadcast_to(std[None, :], mean.shape).shape == mean.shape

    # TODO(synk): FixedNormal.log_probs/entropy/sample/mode are distribution
    # methods, not part of the forward matmul; they are left to downstream JAX.

    print("KERNEL_OK")
</pallas_src>

<mosaic_0001>
module attributes {stable_mosaic.version = 11 : i64} {
  func.func @_diag_gaussian_mean_kernel(%arg0: i32, %arg1: memref<8x32xbf16, #tpu.memory_space<vmem>>, %arg2: memref<32x8xbf16, #tpu.memory_space<vmem>>, %arg3: memref<1x8xf32, #tpu.memory_space<vmem>>, %arg4: memref<8x8xf32, #tpu.memory_space<vmem>>) attributes {dimension_semantics = [#tpu.dimension_semantics<parallel>], iteration_bounds = array<i64: 1>, scalar_prefetch = 0 : i64, scratch_operands = 0 : i64, tpu.core_type = #tpu.core_type<tc>, window_params = [{transform_indices = @transform_0, window_bounds = array<i64: 8, 32>}, {pipeline_mode = #tpu.pipeline_mode<synchronous>, transform_indices = @transform_1, window_bounds = array<i64: 32, 8>}, {pipeline_mode = #tpu.pipeline_mode<synchronous>, transform_indices = @transform_2, window_bounds = array<i64: 1, 8>}, {transform_indices = @transform_3, window_bounds = array<i64: 8, 8>}]} {
    %c0 = arith.constant 0 : index
    %c0_0 = arith.constant 0 : index
    %0 = vector.load %arg1[%c0, %c0_0] : memref<8x32xbf16, #tpu.memory_space<vmem>>, vector<8x32xbf16>
    %c0_1 = arith.constant 0 : index
    %c0_2 = arith.constant 0 : index
    %1 = vector.load %arg2[%c0_1, %c0_2] : memref<32x8xbf16, #tpu.memory_space<vmem>>, vector<32x8xbf16>
    %cst = arith.constant dense<0.000000e+00> : vector<8x8xf32>
    %2 = tpu.matmul %0, %1, %cst {dimension_numbers = #tpu.dot_dimension_numbers<[1], [0], [0], [1], [0, 0, 1, 1], [], []>} : vector<8x32xbf16>, vector<32x8xbf16>, vector<8x8xf32> -> vector<8x8xf32>
    %c0_3 = arith.constant 0 : index
    %c0_4 = arith.constant 0 : index
    %3 = vector.load %arg3[%c0_3, %c0_4] : memref<1x8xf32, #tpu.memory_space<vmem>>, vector<1x8xf32>
    %4 = vector.broadcast %3 : vector<1x8xf32> to vector<8x8xf32>
    %5 = arith.addf %2, %4 : vector<8x8xf32>
    %c0_5 = arith.constant 0 : index
    %c0_6 = arith.constant 0 : index
    %6 = vector.load %arg4[%c0_5, %c0_6] : memref<8x8xf32, #tpu.memory_space<vmem>>, vector<8x8xf32>
    tpu.vector_store %arg4[%c0_5, %c0_6], %5 {strides = array<i32>} : memref<8x8xf32, #tpu.memory_space<vmem>>, vector<8x8xf32>,
    return
  }
  func.func @transform_0(%arg0: i32) -> (i32, i32) {
    %c0_i32 = arith.constant 0 : i32
    %c0_i32_0 = arith.constant 0 : i32
    return %arg0, %c0_i32 : i32, i32
  }
  func.func @transform_1(%arg0: i32) -> (i32, i32) {
    %c0_i32 = arith.constant 0 : i32
    %c0_i32_0 = arith.constant 0 : i32
    %c0_i32_1 = arith.constant 0 : i32
    return %c0_i32, %c0_i32_0 : i32, i32
  }
  func.func @transform_2(%arg0: i32) -> (i32, i32) {
    %c0_i32 = arith.constant 0 : i32
    %c0_i32_0 = arith.constant 0 : i32
    %c0_i32_1 = arith.constant 0 : i32
    return %c0_i32, %c0_i32_0 : i32, i32
  }
  func.func @transform_3(%arg0: i32) -> (i32, i32) {
    %c0_i32 = arith.constant 0 : i32
    %c0_i32_0 = arith.constant 0 : i32
    return %arg0, %c0_i32 : i32, i32
  }
}

</mosaic_0001>

<bundles_post_ra>
// kernel: _forward_impl.1
= control target key start
LH: loop header
LB: loop body
LE: loop exit
PB: predicated region body
PF: predicated region fallthrough
CT: control target
= control target key end

     0   :  { %v144_v1 = vmov 0.0   ;;  %vm145_vm0 = vmmov 0   ;;  %s191_s0 = inlined_call_operand.vmem [shape: bf16[8,32], index: 0, kind: input, shape index: {}]   ;;  %s192_s1 = inlined_call_operand.vmem [shape: bf16[32,8], index: 1, kind: input, shape index: {}]   ;;  %s193_s2 = inlined_call_operand.vmem [shape: f32[1,8], index: 2, kind: input, shape index: {}]   ;;  %s194_s3 = inlined_call_operand.hbm [shape: f32[8,8], index: 3, kind: output, shape index: {}]  }
   0x1   :  { %v118_v0 = vld [vmem:[%s192_s1] sm:$0xff]   ;;  %107 = vmatprep.subr.bf16.mxu0 %v144_v1  ;;  %v119_v2 = vld [vmem:[%s192_s1 + $0x8] sm:$0xff]   ;;  %111 = vmatprep.mubr.msk.bf16.mxu0 %vm145_vm0, %v144_v1 }
   0x2   :  { %108 = vmatpush3.bf16.msra.mxu0 %v118_v0 }
   0x3   :  { %109 = vmatprep.subr.bf16.mxu0 %v144_v1 }
   0x4   :  { %8 = vsyncpa [#allocation3], 0  ;;  %v16_v3 = vld [vmem:[%s191_s0] sm:$0xf]  ;;  %vm40_vm1 = vcmask 261120   ;;  %s146_s20 = smov [#allocation2]  }
   0x5   :  { %v100_v4 = vld [vmem:[%s193_s2] ss:$0 sm:$0xff]  ;;  %s92_s21 = sshll.u32 %s146_s20, 4  ;;  %vm84_vm2 = vcmask 64512   ;;  %s93_s21 = int_to_ptr.vmem [resolvable:$true] %s92_s21 }
   0x6   :  { %110 = vmatpush3.bf16.msra.mxu0 %v119_v2  ;;  %s120_s1 = scalar_lea.vmem %s93_s21, 128  ;;  %p125_p1 = scmp.lt.s32.totalorder %s93_s21, %s93_s21 }
   0x7   :  { %p121_p0 = scmp.ne.s32.totalorder %s93_s21, %s120_s1  ;;  %p126_p2 = scmp.lt.s32.totalorder %s120_s1, %s120_s1 }
   0x9   :  { %112 = vmatmul.mubr.msk.bf16.vlgmr.msra.gmra.mrb[0].mxu0 %vm40_vm1, %v16_v3  ;;  %p127_p3 = por %p126_p2, %p125_p1 }
   0xb   :  { %p128_p4 = pnand %p127_p3, %p121_p0 }
  0xdc   :  { %v78_v5 = vpop.f32.mrb[0].mxu0 }
  0xdd   :  { %v79_v6 = vadd.f32 %v100_v4, %v78_v5  ;;  %v113_v7 = vpop.f32.mrb[1].mxu0 }
  0xde   :  { %v81_v8 = vpop.f32.mrb[2].mxu0 }
  0xdf   :  { %v114_v9 = vpop.f32.mrb[3].mxu0  ;;  %85 = vst.msk [vmem:[#allocation2] sm:$0xff] %vm84_vm2, %v79_v6 }
  0xe0   :  { %131 = shalt.err (!%p128_p4)
}
  0xe1   :  { %s132_s2 = scalar_lea.hbm %s194_s3, 128 }
  0xe2   :  { %p133_p5 = scmp.ne.s32.totalorder %s194_s3, %s132_s2  ;;  %p136_p6 = scmp.lt.u32.totalorder %s132_s2, %s194_s3 }
  0xe4   :  { %p138_p7 = pnand %p136_p6, %p133_p5 }
  0xe6   :  { %141 = shalt.err (!%p138_p7)
}
  0xe7   :  { %95 = dma.vmem_to_hbm [thread:$0]  %s93_s21, 128, %s194_s3, [#allocation3]  }
  0xe8   :  { %142 = dma.done.wait [#allocation3], 128  }
  0xe9   :  { %143 = vsyncadd [#allocation3], 4294967168 }
  0xea   :  { %99 = vsyncpa [#allocation3], 1 }

</bundles_post_ra>
